<compile_context>
chip_gen: v5e
topology: v5e:2x2
jax: 0.10.0
libtpu: 0.0.40
codegen_flags: <defaults>
</compile_context>

<pallas_src>
import math

import jax
import jax.numpy as jnp
from jax.experimental import pallas as pl
from jax.experimental.pallas import tpu as pltpu


# ----------------------------------------------------------------------------- table
def make_pos_encoding(max_length: int, d_model: int, dtype=jnp.float32) -> jnp.ndarray:
    """Deterministic sinusoidal table, shape (max_length, d_model)."""
    # Same constraint as the PyTorch original (odd d_model breaks the 1::2 set).
    assert d_model % 2 == 0, "PositionalEncoding requires an even d_model"
    positions = jnp.arange(0, max_length, dtype=jnp.float32)[:, None]            # (m, 1)
    division_term = jnp.exp(
        jnp.arange(0, d_model, 2, dtype=jnp.float32) * (-math.log(10000.0) / d_model)
    )                                                                             # (d/2,)
    pe = jnp.zeros((max_length, d_model), dtype=jnp.float32)
    pe = pe.at[:, 0::2].set(jnp.sin(positions * division_term))
    pe = pe.at[:, 1::2].set(jnp.cos(positions * division_term))
    return pe.astype(dtype)


# ----------------------------------------------------------------------------- kernel
def _pos_enc_kernel(x_ref, pe_ref, o_ref):
    # x_ref : (tS, tB, D) activation block in VMEM
    # pe_ref: (tS, D) f32 sinusoid block; cast + batch-broadcast in-kernel — VPU
    #         work fully hidden under the DMA of this memory-bound add.
    pe = pe_ref[...].astype(x_ref.dtype)
    o_ref[...] = x_ref[...] + pe[:, None, :]
    # TODO(synk): training-mode dropout (pltpu.prng_seed/prng_random_bits mask +
    # 1/(1-p) scale) not emitted; this matches PyTorch eval/inference behaviour.


# ----------------------------------------------------------------------------- sizing
_MIN_PALLAS_BYTES = 1 << 20   # below ~1 MiB, pallas_call launch overhead dominates
_SLACK_BYTES = 4 << 20        # headroom for Mosaic internal scratch


def _round_up(x: int, m: int) -> int:
    return ((x + m - 1) // m) * m


def _sublane_min(dtype) -> int:
    # rows packed per sublane tile: f32 -> 8, bf16 -> 16, int8/fp8 -> 32
    return {4: 8, 2: 16, 1: 32}.get(jnp.dtype(dtype).itemsize, 8)


def _vmem_capacity_bytes() -> int:
    try:
        return int(pltpu.get_tpu_info().vmem_capacity_bytes)
    except Exception:
        return 64 << 20  # conservative default: v7x per-TensorCore physical VMEM


# ----------------------------------------------------------------------------- forward
def positional_encoding_forward(
    x: jnp.ndarray,
    pos_encoding: jnp.ndarray,
    *,
    tile_seq: int | None = None,
    tile_batch: int | None = None,
    min_pallas_bytes: int = _MIN_PALLAS_BYTES,
    in_place: bool = False,
) -> jnp.ndarray:
    """x: (seq, batch, d_model);  pos_encoding: (max_length, d_model)."""
    S, B, D = x.shape
    assert pos_encoding.ndim == 2 and pos_encoding.shape[0] >= S and pos_encoding.shape[1] == D

    itemsize = jnp.dtype(x.dtype).itemsize
    pe_itemsize = jnp.dtype(pos_encoding.dtype).itemsize
    sub = _sublane_min(x.dtype)

    def _xla_fallback():
        # Fused broadcast add — best choice for tiny / narrow / degenerate shapes.
        return x + pos_encoding[:S].astype(x.dtype)[:, None, :]

    # Lane width < 128 -> masked vst.msk partial stores; batch below the sublane
    # minimum -> heavy padding.  Both are better served by XLA.
    if (x.size * itemsize < min_pallas_bytes) or (D % 128 != 0) or (B < sub):
        return _xla_fallback()

    pe = pos_encoding[:S]  # (S, D) static slice; cast happens inside the kernel.

    capacity = _vmem_capacity_bytes()
    # ~8 MiB x-tiles where VMEM is plentiful (v5e/v6e: 128 MiB/core), ~4 MiB on v7x.
    target_tile_bytes = (8 << 20) if capacity >= (96 << 20) else (4 << 20)
    row_budget = target_tile_bytes // 8  # keep an 8-row-aligned tile within target

    # ---- batch tiling: bound one padded seq-row of the block ------------------
    if tile_batch is None:
        if _round_up(B, sub) * D * itemsize > row_budget:
            tile_batch = max(sub, (row_budget // (D * itemsize)) // sub * sub)
        else:
            tile_batch = B
    tile_batch = int(min(tile_batch, B))
    if tile_batch < B:
        tile_batch = max(sub, (tile_batch // sub) * sub)

    padded_row_bytes = _round_up(tile_batch, sub) * D * itemsize

    # ---- seq tiling: fill the target, keep pe blocks sublane-aligned, and keep
    # at least two seq tiles so v7x's second TensorCore has work -----------------
    if tile_seq is None:
        tile_seq = max(1, target_tile_bytes // padded_row_bytes)
        if tile_batch == B:
            tile_seq = min(tile_seq, pl.cdiv(S, 2))
    tile_seq = int(min(tile_seq, S))
    if tile_seq < S:
        tile_seq = (tile_seq // 8) * 8
        if tile_seq < 8:
            tile_seq = min(8, S)

    # ---- VMEM working set (padded, double-buffered in/out/pe) ------------------
    x_tile_bytes = tile_seq * _round_up(tile_batch, sub) * D * itemsize
    pe_tile_bytes = _round_up(tile_seq, 8) * D * pe_itemsize
    working_set = 4 * x_tile_bytes + 2 * pe_tile_bytes      # 2x x-in, 2x out, 2x pe
    vmem_cap = (3 * capacity) // 4
    if working_set + _SLACK_BYTES > vmem_cap:
        # Degenerate rows (e.g. enormous D with minimal batch): don't fight VMEM.
        return _xla_fallback()
    vmem_limit = max(16 << 20, min(working_set + _SLACK_BYTES, vmem_cap))

    grid = (pl.cdiv(S, tile_seq), pl.cdiv(B, tile_batch))

    extra_kwargs = {}
    if in_place:
        # Only safe if the caller donates x and never reads it again.
        extra_kwargs["input_output_aliases"] = {0: 0}

    cost = pl.CostEstimate(
        flops=S * B * D,
        transcendentals=0,
        bytes_accessed=2 * S * B * D * itemsize + S * D * pe_itemsize,
    )

    return pl.pallas_call(
        _pos_enc_kernel,
        out_shape=jax.ShapeDtypeStruct((S, B, D), x.dtype),
        grid_spec=pltpu.PrefetchScalarGridSpec(
            num_scalar_prefetch=0,
            grid=grid,
            in_specs=[
                pl.BlockSpec((tile_seq, tile_batch, D), lambda i, j: (i, j, 0)),
                pl.BlockSpec((tile_seq, D), lambda i, j: (i, 0)),
            ],
            out_specs=pl.BlockSpec((tile_seq, tile_batch, D), lambda i, j: (i, j, 0)),
        ),
        compiler_params=pltpu.CompilerParams(
            dimension_semantics=("parallel", "parallel"),
            vmem_limit_bytes=int(vmem_limit),
        ),
        cost_estimate=cost,
        **extra_kwargs,
    )(x, pe)


# ----------------------------------------------------------------------------- demo
if __name__ == "__main__":
    key = jax.random.PRNGKey(0)

    # --- Case 1: tiny module-scale shapes (seq=8, batch=2, d_model=32) ---------
    # Narrow D / tiny batch deliberately routes through the fused-XLA fallback.
    d_model, max_length = 32, 16
    seq_len, batch = 8, 2
    x1 = jax.random.normal(key, (seq_len, batch, d_model), dtype=jnp.float32)
    pe1 = make_pos_encoding(max_length, d_model)
    out1 = jax.block_until_ready(positional_encoding_forward(x1, pe1))
    ref1 = x1 + pe1[:seq_len][:, None, :]
    assert out1.shape == (seq_len, batch, d_model)
    assert jnp.allclose(out1, ref1, atol=1e-6), "mismatch vs reference (fallback path)"

    # --- Case 2: lane-dense Pallas path, auto tiling (>=2 seq tiles, grid=(2,1)) -
    d2, m2, s2, b2 = 128, 128, 64, 8
    k1, k2 = jax.random.split(key)
    x2 = jax.random.normal(k1, (s2, b2, d2), dtype=jnp.float32)
    pe2 = make_pos_encoding(m2, d2)
    out2 = jax.block_until_ready(positional_encoding_forward(x2, pe2, min_pallas_bytes=0))
    ref2 = x2 + pe2[:s2][:, None, :]
    assert out2.shape == (s2, b2, d2)
    assert jnp.allclose(out2, ref2, atol=1e-6), "mismatch vs reference (Pallas, seq grid)"

    # --- Case 3: 2-D grid (seq x batch tiles), bf16, explicit tile overrides ----
    d3, m3, s3, b3 = 128, 32, 16, 64
    x3 = jax.random.normal(k2, (s3, b3, d3), dtype=jnp.bfloat16)
    pe3 = make_pos_encoding(m3, d3)
    out3 = jax.block_until_ready(
        positional_encoding_forward(x3, pe3, tile_seq=8, tile_batch=32, min_pallas_bytes=0)
    )
    ref3 = x3 + pe3[:s3].astype(jnp.bfloat16)[:, None, :]
    assert out3.shape == (s3, b3, d3)
    assert jnp.allclose(
        out3.astype(jnp.float32), ref3.astype(jnp.float32), atol=6e-2
    ), "mismatch vs reference (Pallas, seq x batch grid)"

    print("KERNEL_OK")
</pallas_src>

<mosaic_0001>
module attributes {stable_mosaic.version = 11 : i64} {
  func.func @_pos_enc_kernel(%arg0: i32, %arg1: i32, %arg2: memref<32x8x128xf32, #tpu.memory_space<vmem>>, %arg3: memref<32x128xf32, #tpu.memory_space<vmem>>, %arg4: memref<32x8x128xf32, #tpu.memory_space<vmem>>) attributes {dimension_semantics = [#tpu.dimension_semantics<parallel>, #tpu.dimension_semantics<parallel>], iteration_bounds = array<i64: 2, 1>, scalar_prefetch = 0 : i64, scratch_operands = 0 : i64, tpu.core_type = #tpu.core_type<tc>, window_params = [{transform_indices = @transform_0, window_bounds = array<i64: 32, 8, 128>}, {transform_indices = @transform_1, window_bounds = array<i64: 32, 128>}, {transform_indices = @transform_2, window_bounds = array<i64: 32, 8, 128>}]} {
    %c0 = arith.constant 0 : index
    %c0_0 = arith.constant 0 : index
    %0 = vector.load %arg3[%c0, %c0_0] : memref<32x128xf32, #tpu.memory_space<vmem>>, vector<32x128xf32>
    %c0_1 = arith.constant 0 : index
    %c0_2 = arith.constant 0 : index
    %c0_3 = arith.constant 0 : index
    %1 = vector.load %arg2[%c0_1, %c0_2, %c0_3] : memref<32x8x128xf32, #tpu.memory_space<vmem>>, vector<32x8x128xf32>
    %2 = vector.shape_cast %0 : vector<32x128xf32> to vector<32x1x128xf32>
    %3 = vector.broadcast %2 : vector<32x1x128xf32> to vector<32x8x128xf32>
    %4 = arith.addf %1, %3 : vector<32x8x128xf32>
    %c0_4 = arith.constant 0 : index
    %c0_5 = arith.constant 0 : index
    %c0_6 = arith.constant 0 : index
    %5 = vector.load %arg4[%c0_4, %c0_5, %c0_6] : memref<32x8x128xf32, #tpu.memory_space<vmem>>, vector<32x8x128xf32>
    tpu.vector_store %arg4[%c0_4, %c0_5, %c0_6], %4 {strides = array<i32>} : memref<32x8x128xf32, #tpu.memory_space<vmem>>, vector<32x8x128xf32>,
    return
  }
  func.func @transform_0(%arg0: i32, %arg1: i32) -> (i32, i32, i32) {
    %c0_i32 = arith.constant 0 : i32
    %c0_i32_0 = arith.constant 0 : i32
    return %arg0, %arg1, %c0_i32 : i32, i32, i32
  }
  func.func @transform_1(%arg0: i32, %arg1: i32) -> (i32, i32) {
    %c0_i32 = arith.constant 0 : i32
    %c0_i32_0 = arith.constant 0 : i32
    return %arg0, %c0_i32 : i32, i32
  }
  func.func @transform_2(%arg0: i32, %arg1: i32) -> (i32, i32, i32) {
    %c0_i32 = arith.constant 0 : i32
    %c0_i32_0 = arith.constant 0 : i32
    return %arg0, %arg1, %c0_i32 : i32, i32, i32
  }
}

</mosaic_0001>

<bundles_post_ra>
// kernel: tpu_custom_call.1
= control target key start
LH: loop header
LB: loop body
LE: loop exit
PB: predicated region body
PF: predicated region fallthrough
CT: control target
= control target key end

     0   :  { %7 = vsyncpa [#allocation3], 0  ;;  %s1030_s0 = inlined_call_operand.hbm [shape: f32[64,8,128], index: 0, kind: input, shape index: {}]   ;;  %s1031_s1 = inlined_call_operand.hbm [shape: f32[64,128], index: 1, kind: input, shape index: {}]   ;;  %s1032_s2 = inlined_call_operand.hbm [shape: f32[64,8,128], index: 2, kind: output, shape index: {}]  }
   0x1   :  { %9 = vsyncpa [#allocation3 + $0x1], 0 }
   0x2   :  { %10 = vsyncpa [#allocation6], 0 }
   0x3   :  { %12 = vsyncpa [#allocation6 + $0x1], 0 }
   0x4   :  { %13 = vsyncpa [#allocation4], 0 }
   0x5   :  { %15 = vsyncpa [#allocation4 + $0x1], 0  ;;  %s807_s9 = smov 0   ;;  %s809_s10 = smov 0  }
   0x6   :  { %s811_s11 = smov 0   ;;  %s813_s12 = smov 0  }
   0x7   :  { %s815_s13 = smov 0   ;;  %s817_s14 = smov 0  }
   0x8 LB: > { %s547_s15 = sadd.s32 4294967295, %s786_s14   ;;  %s548_s16 = sadd.s32 4294967294, %s786_s14   ;;  %s786_s14 = sphi %s817_s14, %s21_s14   ;;  %s782_s13 = sphi %s815_s13, %s1042_s13   ;;  %s778_s12 = sphi %s813_s12, %s1041_s12   ;;  %s774_s11 = sphi %s811_s11, %s1040_s11   ;;  %s770_s10 = sphi %s809_s10, %s1039_s10   ;;  %s766_s9 = sphi %s807_s9, %s1038_s9  }
   0x9   : > { %s33_s17 = sadd.s32 1, %s782_s13  ;;  %s42_s18 = sadd.s32 1, %s774_s11 }
   0xa   : > { %p35_p0 = scmp.ge.s32.totalorder %s33_s17, 2  ;;  %p49_p1 = scmp.ne.s32.totalorder %s774_s11, %s770_s10 }
   0xb   : > { %p50_p2 = scmp.eq.s32.totalorder %s786_s14, 0  ;;  %p55_p3 = scmp.ne.s32.totalorder %s770_s10, %s766_s9 }
   0xc   : > { %s1044_s17 = smov (%p35_p0, %s33_s17), 0  ;;  %p56_p5 = scmp.eq.s32.totalorder %s547_s15, 0 }
   0xd   : > { %p848_p4 = por %p50_p2, %p49_p1  ;;  %s37_s20 = ssub.s32 %s782_s13, %s1044_s17 }
   0xe   : > { %p107_p6 = scmp.eq.s32.totalorder %s547_s15, 1  ;;  %p40_p7 = scmp.eq.s32.totalorder %s37_s20, 0 }
   0xf   : > { %p854_p8 = por %p56_p5, %p55_p3  ;;  %p113_p10 = scmp.eq.s32.totalorder %s548_s16, 1 }
  0x10   : > { %p858_p9 = por %p107_p6, %p49_p1  ;;  %p550_p12 = scmp.ge.s32.totalorder %s786_s14, 2 }
  0x11   : > { %s863_s23 = scalar_select %p40_p7, %s774_s11, %s42_s18  }
  0x12   : > { %p865_p11 = por %p113_p10, %p55_p3  ;;  %p586_p13 = scmp.lt.s32.totalorder %s786_s14, 2 }
  0x13   : > { %s872_s25 = sand.u32 1, %s774_s11   ;;  %s566_s27 = sshll.u32 %s782_s13, 8 }
  0x14   : > { %s551_s26 = sshll.u32 %s872_s25, 8  ;;  %s143_s30 = scalar_lea.hbm %s1030_s0, %s566_s27 }
  0x15   : > { %s137_s3 = scalar_lea.vmem [#allocation2], %s551_s26  ;;  %s144_s5 = sshll.u32 %s143_s30, 4  ;;  %s145_s5 = int_to_ptr.hbm [resolvable:$true] %s144_s5 }
  0x16   : > { %s146_s4 = sshll.u32 %s137_s3, 4  ;;  %p881_p0 = pnand %p586_p13, %p848_p4  ;;  %s147_s4 = int_to_ptr.vmem [resolvable:$true] %s146_s4 }
  0x17   : > { %p557_p1 = scmp.ge.s32.totalorder %s786_s14, 1  ;;  %s134_s7 = scalar_lea.sflag [#allocation3], %s872_s25 }
  0x18   : > { %s788_s8 = smov 128   ;;  %s789_s15 = smov 8  }
  0x19   : > { %578 = dma.hbm_to_vmem [thread:$0]  (!%p881_p0), %s145_s5, 4096, %s147_s4, %s134_s7, %s788_s8, %s788_s8, %s789_s15  }
  0x1a   : > { %p176_p2 = scmp.lt.s32.totalorder %s786_s14, 3  ;;  %s554_s16 = sshll.u32 %s872_s25, 5 }
  0x1b   : > { %s567_s18 = sshll.u32 %s782_s13, 5  ;;  %s160_s27 = scalar_lea.vmem [#allocation5], %s554_s16 }
  0x1c   : > { %p177_p3 = pnand %p557_p1, %p176_p2  ;;  %s165_s19 = scalar_lea.hbm %s1031_s1, %s567_s18 }
  0x1d   : > { %s168_s28 = sshll.u32 %s160_s27, 4  ;;  %s166_s29 = sshll.u32 %s165_s19, 4  ;;  %s169_s28 = int_to_ptr.vmem [resolvable:$true] %s168_s28  ;;  %s167_s29 = int_to_ptr.hbm [resolvable:$true] %s166_s29 }
  0x1e   : > { %s157_s30 = scalar_lea.sflag [#allocation6], %s872_s25  ;;  %180 = sbr.rel (%p177_p3) target bundleno = 80 (0x50), region = 28 }
  0x1f   : > { %581 = dma.hbm_to_vmem [thread:$0]  (!%p881_p0), %s167_s29, 512, %s169_s28, %s157_s30, %s788_s8, %s788_s8, %s789_s15  }
  0x20   : > { %s899_s3 = sand.u32 (!%p177_p3), 1, %s770_s10  }
  0x21   : > { %s558_s4 = sshll.u32 (!%p177_p3), %s899_s3, 8  ;;  %s183_s5 = scalar_lea.sflag (!%p177_p3), [#allocation3], %s899_s3 }
  0x22   : > { %s905_s7 = scalar_lea.vmem (!%p177_p3), [#allocation2], %s558_s4 }
  0x23   : > { %753 = dma.done.wait (%p854_p8), %s183_s5, 4096  }
  0x24   : > { %755 = vsyncadd (%p854_p8), %s183_s5, 4294963200  ;;  %s559_s25 = sshll.u32 %s899_s3, 5  ;;  %s193_s6 = scalar_lea.sflag [#allocation6], %s899_s3 }
  0x25   : > { %s913_s8 = scalar_lea.vmem [#allocation5], %s559_s25 }
  0x26   : > { %757 = dma.done.wait (%p854_p8), %s193_s6, 512  }
  0x27   : > { %759 = vsyncadd (%p854_p8), %s193_s6, 4294966784  ;;  %v226_v0 = vld [vmem:[%s913_s8] sm:$0xff]  ;;  %v231_v6 = vld [vmem:[%s905_s7 + $0x8] sm:$0xff]  ;;  %s930_s21 = scalar_lea.vmem [#allocation7], %s558_s4  ;;  %s568_s15 = sshll.u32 %s778_s12, 8 }
  0x28   : > { %v230_v1 = vld [vmem:[%s905_s7] sm:$0xff]  ;;  %v294_v2 = vperm.slane %v226_v0, 0  ;;  %v266_v3 = vrot.slane %v226_v0, 1  ;;  %v267_v4 = vrot.slane %v226_v0, 2  ;;  %v268_v5 = vrot.slane %v226_v0, 3  ;;  %v232_v7 = vld [vmem:[%s905_s7 + $0x10] sm:$0xff]  ;;  %s435_s18 = scalar_lea.hbm %s1032_s2, %s568_s15 }
  0x29   : > { %v233_v8 = vld [vmem:[%s905_s7 + $0x18] sm:$0xff]  ;;  %v269_v9 = vrot.slane %v226_v0, 4  ;;  %v270_v10 = vrot.slane %v226_v0, 5  ;;  %v271_v11 = vrot.slane %v226_v0, 6  ;;  %v234_v16 = vld [vmem:[%s905_s7 + $0x20] sm:$0xff]  ;;  %v235_v17 = vld [vmem:[%s905_s7 + $0x28] sm:$0xff] }
  0x2a   : > { %v358_v12 = vadd.f32 %v294_v2, %v230_v1  ;;  %v295_v13 = vperm.slane %v266_v3, 0  ;;  %v296_v14 = vperm.slane %v267_v4, 0  ;;  %v297_v15 = vperm.slane %v268_v5, 0  ;;  %v236_v20 = vld [vmem:[%s905_s7 + $0x30] sm:$0xff]  ;;  %v227_v23 = vld [vmem:[%s913_s8 + $0x8] sm:$0xff]  ;;  %v237_v27 = vld [vmem:[%s905_s7 + $0x38] sm:$0xff] }
  0x2b   : > { %v298_v18 = vperm.slane %v269_v9, 0  ;;  %v299_v19 = vperm.slane %v270_v10, 0  ;;  %v300_v21 = vperm.slane %v271_v11, 0  ;;  %v272_v22 = vrot.slane %v226_v0, 7  ;;  %v238_v33 = vld [vmem:[%s905_s7 + $0x40] sm:$0xff]  ;;  %v239_v38 = vld [vmem:[%s905_s7 + $0x48] sm:$0xff] }
  0x2c   : > { %390 = vst [vmem:[%s930_s21] sm:$0xff] %v358_v12  ;;  %v359_v24 = vadd.f32 %v295_v13, %v231_v6  ;;  %v360_v25 = vadd.f32 %v296_v14, %v232_v7  ;;  %v361_v26 = vadd.f32 %v297_v15, %v233_v8  ;;  %v302_v31 = vperm.slane %v227_v23, 0  ;;  %v240_v39 = vld [vmem:[%s905_s7 + $0x50] sm:$0xff]  ;;  %v241_v45 = vld [vmem:[%s905_s7 + $0x58] sm:$0xff]  ;;  %v242_v52 = vld [vmem:[%s905_s7 + $0x60] sm:$0xff]  ;;  %s436_s20 = sshll.u32 %s930_s21, 4  ;;  %s438_s26 = sshll.u32 %s435_s18, 4  ;;  %s437_s20 = int_to_ptr.vmem [resolvable:$true] %s436_s20  ;;  %s439_s26 = int_to_ptr.hbm [resolvable:$true] %s438_s26 }
  0x2d   : > { %v362_v28 = vadd.f32 %v298_v18, %v234_v16  ;;  %v363_v29 = vadd.f32 %v299_v19, %v235_v17  ;;  %v301_v30 = vperm.slane %v272_v22, 0  ;;  %v364_v32 = vadd.f32 %v300_v21, %v236_v20  ;;  %v228_v50 = vld [vmem:[%s913_s8 + $0x10] sm:$0xff]  ;;  %v243_v56 = vld [vmem:[%s905_s7 + $0x68] sm:$0xff]  ;;  %v245_v0 = vld [vmem:[%s905_s7 + $0x78] sm:$0xff]  ;;  %s423_s19 = scalar_lea.sflag [#allocation4], %s899_s3  ;;  %s714_s27 = sshra.s32 %s439_s26, 4  ;;  %s715_s27 = int_to_ptr.hbm [resolvable:$true] %s714_s27 }
  0x2e   : > { %391 = vst [vmem:[%s930_s21 + $0x8] sm:$0xff] %v359_v24  ;;  %v273_v34 = vrot.slane %v227_v23, 1  ;;  %v274_v35 = vrot.slane %v227_v23, 2  ;;  %v275_v36 = vrot.slane %v227_v23, 3  ;;  %v276_v40 = vrot.slane %v227_v23, 4  ;;  %v244_v58 = vld [vmem:[%s905_s7 + $0x70] sm:$0xff]  ;;  %p721_p7 = scmp.lt.s32.totalorder %s715_s27, %s1032_s2 }
  0x2f   : > { %392 = vst [vmem:[%s930_s21 + $0x10] sm:$0xff] %v360_v25  ;;  %v365_v37 = vadd.f32 %v301_v30, %v237_v27  ;;  %v277_v41 = vrot.slane %v227_v23, 5  ;;  %v278_v42 = vrot.slane %v227_v23, 6  ;;  %v279_v47 = vrot.slane %v227_v23, 7  ;;  %v246_v4 = vld [vmem:[%s905_s7 + $0x80] sm:$0xff]  ;;  %v247_v8 = vld [vmem:[%s905_s7 + $0x88] sm:$0xff] }
  0x30   : > { %393 = vst [vmem:[%s930_s21 + $0x18] sm:$0xff] %v361_v26  ;;  %v303_v43 = vperm.slane %v273_v34, 0  ;;  %v304_v44 = vperm.slane %v274_v35, 0  ;;  %v305_v46 = vperm.slane %v275_v36, 0  ;;  %v366_v48 = vadd.f32 %v302_v31, %v238_v33  ;;  %v229_v11 = vld [vmem:[%s913_s8 + $0x18] sm:$0xff]  ;;  %v248_v13 = vld [vmem:[%s905_s7 + $0x90] sm:$0xff] }
  0x31   : > { %394 = vst [vmem:[%s930_s21 + $0x20] sm:$0xff] %v362_v28  ;;  %v306_v49 = vperm.slane %v276_v40, 0  ;;  %v307_v53 = vperm.slane %v277_v41, 0  ;;  %v308_v57 = vperm.slane %v278_v42, 0  ;;  %v309_v59 = vperm.slane %v279_v47, 0  ;;  %v249_v17 = vld [vmem:[%s905_s7 + $0x98] sm:$0xff] }
  0x32   : > { %395 = vst [vmem:[%s930_s21 + $0x28] sm:$0xff] %v363_v29  ;;  %v367_v51 = vadd.f32 %v303_v43, %v239_v38  ;;  %v368_v54 = vadd.f32 %v304_v44, %v240_v39  ;;  %v369_v55 = vadd.f32 %v305_v46, %v241_v45  ;;  %v280_v60 = vrot.slane %v228_v50, 1  ;;  %v250_v20 = vld [vmem:[%s905_s7 + $0xa0] sm:$0xff]  ;;  %v251_v24 = vld [vmem:[%s905_s7 + $0xa8] sm:$0xff]  ;;  %v252_v28 = vld [vmem:[%s905_s7 + $0xb0] sm:$0xff]  ;;  %s716_s28 = scalar_lea.hbm %s715_s27, 256 }
  0x33   : > { %396 = vst [vmem:[%s930_s21 + $0x30] sm:$0xff] %v364_v32  ;;  %v281_v61 = vrot.slane %v228_v50, 2  ;;  %v282_v62 = vrot.slane %v228_v50, 3  ;;  %v370_v63 = vadd.f32 %v306_v49, %v242_v52  ;;  %v310_v1 = vperm.slane %v228_v50, 0  ;;  %v253_v32 = vld [vmem:[%s905_s7 + $0xb8] sm:$0xff]  ;;  %v254_v36 = vld [vmem:[%s905_s7 + $0xc0] sm:$0xff]  ;;  %p717_p4 = scmp.ne.s32.totalorder %s715_s27, %s716_s28 }
  0x34   : > { %397 = vst [vmem:[%s930_s21 + $0x38] sm:$0xff] %v365_v37  ;;  %v283_v2 = vrot.slane %v228_v50, 4  ;;  %v371_v3 = vadd.f32 %v307_v53, %v243_v56  ;;  %v311_v5 = vperm.slane %v280_v60, 0  ;;  %v284_v6 = vrot.slane %v228_v50, 5  ;;  %v255_v40 = vld [vmem:[%s905_s7 + $0xc8] sm:$0xff]  ;;  %v256_v44 = vld [vmem:[%s905_s7 + $0xd0] sm:$0xff] }
  0x35   : > { %398 = vst [vmem:[%s930_s21 + $0x40] sm:$0xff] %v366_v48  ;;  %v372_v7 = vadd.f32 %v308_v57, %v244_v58  ;;  %v312_v9 = vperm.slane %v281_v61, 0  ;;  %v285_v10 = vrot.slane %v228_v50, 6  ;;  %v373_v12 = vadd.f32 %v309_v59, %v245_v0  ;;  %v257_v48 = vld [vmem:[%s905_s7 + $0xd8] sm:$0xff]  ;;  %v260_v57 = vld [vmem:[%s905_s7 + $0xf0] sm:$0xff]  ;;  %p718_p5 = pnand %p717_p4, %p858_p9  ;;  %s720_s4 = scalar_lea.hbm %s1032_s2, 512 }
  0x36   : > { %399 = vst [vmem:[%s930_s21 + $0x48] sm:$0xff] %v367_v51  ;;  %v313_v14 = vperm.slane %v282_v62, 0  ;;  %v286_v15 = vrot.slane %v228_v50, 7  ;;  %v374_v16 = vadd.f32 %v310_v1, %v246_v4  ;;  %v314_v18 = vperm.slane %v283_v2, 0  ;;  %v258_v51 = vld [vmem:[%s905_s7 + $0xe0] sm:$0xff]  ;;  %v261_v60 = vld [vmem:[%s905_s7 + $0xf8] sm:$0xff]  ;;  %p722_p8 = scmp.lt.s32.totalorder %s720_s4, %s716_s28 }
  0x37   : > { %400 = vst [vmem:[%s930_s21 + $0x50] sm:$0xff] %v368_v54  ;;  %v375_v19 = vadd.f32 %v311_v5, %v247_v8  ;;  %v315_v21 = vperm.slane %v284_v6, 0  ;;  %v287_v22 = vrot.slane %v229_v11, 1  ;;  %v376_v23 = vadd.f32 %v312_v9, %v248_v13  ;;  %v259_v54 = vld [vmem:[%s905_s7 + $0xe8] sm:$0xff]  ;;  %p719_p6 = pneg %p718_p5 }
  0x38   : > { %401 = vst [vmem:[%s930_s21 + $0x58] sm:$0xff] %v369_v55  ;;  %v316_v25 = vperm.slane %v285_v10, 0  ;;  %v288_v26 = vrot.slane %v229_v11, 2  ;;  %v377_v27 = vadd.f32 %v313_v14, %v249_v17  ;;  %v317_v29 = vperm.slane %v286_v15, 0  ;;  %p723_p10 = por %p722_p8, %p721_p7 }
  0x39   : > { %402 = vst [vmem:[%s930_s21 + $0x60] sm:$0xff] %v370_v63  ;;  %v289_v30 = vrot.slane %v229_v11, 3  ;;  %v378_v31 = vadd.f32 %v314_v18, %v250_v20  ;;  %v318_v33 = vperm.slane %v229_v11, 0  ;;  %v290_v34 = vrot.slane %v229_v11, 4 }
  0x3a   : > { %403 = vst [vmem:[%s930_s21 + $0x68] sm:$0xff] %v371_v3  ;;  %v379_v35 = vadd.f32 %v315_v21, %v251_v24  ;;  %v319_v37 = vperm.slane %v287_v22, 0  ;;  %v291_v38 = vrot.slane %v229_v11, 5  ;;  %v380_v39 = vadd.f32 %v316_v25, %v252_v28  ;;  %p724_p13 = pnand %p723_p10, %p719_p6 }
  0x3b   : > { %404 = vst [vmem:[%s930_s21 + $0x70] sm:$0xff] %v372_v7  ;;  %v320_v41 = vperm.slane %v288_v26, 0  ;;  %v292_v42 = vrot.slane %v229_v11, 6  ;;  %v381_v43 = vadd.f32 %v317_v29, %v253_v32  ;;  %v321_v45 = vperm.slane %v289_v30, 0 }
  0x3c   : > { %405 = vst [vmem:[%s930_s21 + $0x78] sm:$0xff] %v373_v12  ;;  %v293_v46 = vrot.slane %v229_v11, 7  ;;  %v382_v47 = vadd.f32 %v318_v33, %v254_v36  ;;  %v322_v49 = vperm.slane %v290_v34, 0  ;;  %v383_v50 = vadd.f32 %v319_v37, %v255_v40 }
  0x3d   : > { %406 = vst [vmem:[%s930_s21 + $0x80] sm:$0xff] %v374_v16  ;;  %v323_v52 = vperm.slane %v291_v38, 0  ;;  %v384_v53 = vadd.f32 %v320_v41, %v256_v44  ;;  %v324_v55 = vperm.slane %v292_v42, 0  ;;  %v385_v56 = vadd.f32 %v321_v45, %v257_v48 }
  0x3e   : > { %407 = vst [vmem:[%s930_s21 + $0x88] sm:$0xff] %v375_v19  ;;  %v325_v58 = vperm.slane %v293_v46, 0  ;;  %v386_v59 = vadd.f32 %v322_v49, %v258_v51 }
  0x3f   : > { %408 = vst [vmem:[%s930_s21 + $0x90] sm:$0xff] %v376_v23  ;;  %v387_v61 = vadd.f32 %v323_v52, %v259_v54  ;;  %v388_v62 = vadd.f32 %v324_v55, %v260_v57 }
  0x40   : > { %409 = vst [vmem:[%s930_s21 + $0x98] sm:$0xff] %v377_v27  ;;  %v389_v63 = vadd.f32 %v325_v58, %v261_v60 }
  0x41   : > { %410 = vst [vmem:[%s930_s21 + $0xa0] sm:$0xff] %v378_v31 }
  0x42   : > { %411 = vst [vmem:[%s930_s21 + $0xa8] sm:$0xff] %v379_v35 }
  0x43   : > { %412 = vst [vmem:[%s930_s21 + $0xb0] sm:$0xff] %v380_v39 }
  0x44   : > { %413 = vst [vmem:[%s930_s21 + $0xb8] sm:$0xff] %v381_v43 }
  0x45   : > { %414 = vst [vmem:[%s930_s21 + $0xc0] sm:$0xff] %v382_v47 }
  0x46   : > { %415 = vst [vmem:[%s930_s21 + $0xc8] sm:$0xff] %v383_v50 }
  0x47   : > { %416 = vst [vmem:[%s930_s21 + $0xd0] sm:$0xff] %v384_v53 }
  0x48   : > { %417 = vst [vmem:[%s930_s21 + $0xd8] sm:$0xff] %v385_v56 }
  0x49   : > { %418 = vst [vmem:[%s930_s21 + $0xe0] sm:$0xff] %v386_v59 }
  0x4a   : > { %419 = vst [vmem:[%s930_s21 + $0xe8] sm:$0xff] %v387_v61 }
  0x4b   : > { %420 = vst [vmem:[%s930_s21 + $0xf0] sm:$0xff] %v388_v62 }
  0x4c   : > { %421 = vst [vmem:[%s930_s21 + $0xf8] sm:$0xff] %v389_v63 }
  0x4d   : > { %727 = shalt.err (!%p724_p13)
}
  0x4e   : > { %s790_s3 = smov 128   ;;  %s791_s25 = smov 8  }
  0x4f   : > { %573 = dma.vmem_to_hbm [thread:$0]  (%p858_p9), %s437_s20, 4096, %s439_s26, %s423_s19, %s790_s3, %s790_s3, %s791_s25  }
  0x50 PF: > { %s453_s6 = sand.u32 1, %s766_s9   ;;  %p583_p0 = pnand %p550_p12, %p865_p11 }
  0x51   : > { %s454_s8 = scalar_lea.sflag [#allocation4], %s453_s6 }
  0x52   : > { %p584_p1 = pneg %p583_p0 }
  0x54   : > { %761 = dma.done.wait (%p584_p1), %s454_s8, 4096  }
  0x55   : > { %763 = vsyncadd (%p584_p1), %s454_s8, 4294963200  ;;  %s21_s14 = sadd.s32 1, %s786_s14   ;;  %s1038_s9 = smov %s770_s10 }
  0x56   : > { %p18_p2 = scmp.ge.s32.totalorder %s21_s14, 4   ;;  %s1039_s10 = smov %s774_s11 }
  0x57   : > { %s1040_s11 = smov %s863_s23  ;;  %s1041_s12 = smov %s782_s13 }
  0x58   : > { %s1042_s13 = smov %s1044_s17  ;;  %20 = sbr.rel (!%p18_p2) target bundleno = 8 (0x8), region = 86 }
  0x5d   :  { %460 = vsyncpa [#allocation3], 1 }
  0x5e   :  { %462 = vsyncpa [#allocation3 + $0x1], 1 }
  0x5f   :  { %463 = vsyncpa [#allocation6], 1 }
  0x60   :  { %465 = vsyncpa [#allocation6 + $0x1], 1 }
  0x61   :  { %466 = vsyncpa [#allocation4], 1 }
  0x62   :  { %468 = vsyncpa [#allocation4 + $0x1], 1 }

</bundles_post_ra>
